<compile_context>
chip_gen: v7x
topology: tpu7x:2x2x1
jax: 0.10.0
libtpu: 0.0.40
codegen_flags: <defaults>
</compile_context>

<pallas_src>
import math
from functools import partial

import jax
import jax.numpy as jnp
from jax.experimental import pallas as pl
from jax.experimental.pallas import tpu as pltpu

LANE = 128


def _round_up(x, m):
    return ((x + m - 1) // m) * m


def _nbytes(a):
    return a.size * a.dtype.itemsize


def make_policy_kernel(num_hidden_layers: int, action_bound: float,
                       a_pad: int):
    """Build the Pallas kernel closure for a fixed number of hidden layers."""
    LOG_SQRT_2PI = 0.5 * math.log(2.0 * math.pi)

    def kernel(*refs):
        # refs layout (inputs then outputs):
        #   x (tb, S) f32,
        #   (w_i bf16, b_i f32) for each hidden layer,
        #   w_heads (H, 2*A_pad) bf16, b_heads (1, 2*A_pad) f32,
        #   eps (tb, A_pad) f32,
        #   act_ref (tb, A_pad) f32, lp_ref (tb, A_pad) f32.
        idx = 0
        h = refs[idx][...]
        idx += 1

        # Hidden MLP: Linear + ReLU, repeated. bf16 operands, f32 accumulate.
        for _ in range(num_hidden_layers):
            w = refs[idx][...]          # bf16 weight (in, out)
            b = refs[idx + 1][...]      # f32 bias (1, out)
            idx += 2
            h = jnp.dot(h.astype(jnp.bfloat16), w,
                        preferred_element_type=jnp.float32) + b
            h = jnp.maximum(h, 0.0)

        w_heads = refs[idx][...]
        b_heads = refs[idx + 1][...]
        eps = refs[idx + 2][...]
        act_ref = refs[idx + 3]
        lp_ref = refs[idx + 4]

        # Fused, lane-padded mu/std head: single MXU dot; the split below is a
        # 128-lane-aligned vreg slice (free).
        heads = jnp.dot(h.astype(jnp.bfloat16), w_heads,
                        preferred_element_type=jnp.float32) + b_heads
        mu = heads[:, :a_pad]
        pre_std = heads[:, a_pad:]

        # softplus(x) = log(1 + exp(x)), numerically stable, f32 on the EUP.
        std = jnp.logaddexp(pre_std, 0.0)

        # Reparameterized sample: mu + std * eps  (eps ~ N(0, 1)).
        normal_sample = mu + std * eps

        # Normal(mu, std) log-prob at normal_sample.
        # (normal_sample - mu) / std == eps, so the divide is skipped.
        log_prob = -0.5 * eps * eps - jnp.log(std) - LOG_SQRT_2PI

        # Tanh squash. NOTE: the reference applies tanh *again* inside the
        # correction term (tanh(action) with action = tanh(sample)); this is
        # reproduced exactly to preserve the module's semantics.
        action = jnp.tanh(normal_sample)
        log_prob = log_prob - jnp.log(1.0 - jnp.tanh(action) ** 2 + 1e-07)

        # Two lane-dense, unmasked stores.
        act_ref[...] = action * action_bound
        lp_ref[...] = log_prob

    return kernel


def policy_net_forward(x, kparams, eps, *, num_hidden_layers, action_bound,
                       block_batch=1024):
    """PolicyNet forward pass as one batch-tiled pallas_call.

    kparams: dict from prepare_kernel_params():
      'hidden': list of (W bf16 (in,out), b f32 (1,out)),
      'heads' : (W bf16 (hidden, 2*A_pad), b f32 (1, 2*A_pad))  = [mu | std]
                with each head zero-padded to a 128-lane boundary.
    eps: (batch, action_dim) f32 standard-normal noise.
    Returns (action (batch, A), log_prob (batch, A)).
    """
    batch, state_dim = x.shape
    action_dim = eps.shape[1]
    w_heads, b_heads = kparams["heads"]
    a_pad = w_heads.shape[1] // 2
    hidden_dim = kparams["hidden"][0][0].shape[1]

    # Zero-pad eps to the lane-aligned head width (padded lanes stay finite:
    # mu=0, std=softplus(0), eps=0).
    if a_pad != action_dim:
        eps_p = jnp.zeros((batch, a_pad), jnp.float32).at[:, :action_dim].set(eps)
    else:
        eps_p = eps

    # Batch tile: whole batch for <=1024 rows (grid of 1), else 1024-row tiles
    # (amortizes the ~0.35us/step overhead; activation tiles are tiny).
    if batch <= 1024:
        tb = batch
    else:
        tb = min(block_batch, batch)
    grid = (pl.cdiv(batch, tb),)

    resident = dict(pipeline_mode=pl.Buffered(1))  # weights: single-buffered

    inputs = [x]
    in_specs = [pl.BlockSpec((tb, state_dim), lambda i: (i, 0))]
    for w, b in kparams["hidden"]:
        inputs += [w, b]
        # Constant index_map -> VMEM-resident across grid steps; Buffered(1)
        # avoids a useless second copy.
        in_specs += [pl.BlockSpec(w.shape, lambda i: (0, 0), **resident),
                     pl.BlockSpec(b.shape, lambda i: (0, 0), **resident)]
    inputs += [w_heads, b_heads, eps_p]
    in_specs += [pl.BlockSpec(w_heads.shape, lambda i: (0, 0), **resident),
                 pl.BlockSpec(b_heads.shape, lambda i: (0, 0), **resident),
                 pl.BlockSpec((tb, a_pad), lambda i: (i, 0))]

    out_shape = (jax.ShapeDtypeStruct((batch, a_pad), jnp.float32),
                 jax.ShapeDtypeStruct((batch, a_pad), jnp.float32))
    out_specs = (pl.BlockSpec((tb, a_pad), lambda i: (i, 0)),
                 pl.BlockSpec((tb, a_pad), lambda i: (i, 0)))

    # --- VMEM / sharding bookkeeping -------------------------------------
    weight_bytes = sum(_nbytes(w) + _nbytes(b) for w, b in kparams["hidden"])
    weight_bytes += _nbytes(w_heads) + _nbytes(b_heads)
    # Per-step streamed tiles (x, eps, 2 outputs), double-buffered.
    io_tile_bytes = tb * (state_dim + 3 * a_pad) * 4
    # Headroom for in-kernel intermediates (h, heads) + compiler scratch.
    scratch_bytes = 2 * tb * (hidden_dim + 2 * a_pad) * 4
    vmem_limit = weight_bytes + 2 * io_tile_bytes + scratch_bytes + (4 << 20)
    vmem_limit = int(min(max(vmem_limit, 8 << 20), 48 << 20))  # v7x: 64MiB/TC

    # Only batch-shard across TensorCores when activation traffic dominates;
    # otherwise megacore sharding just duplicates the weight DMA (per-TC VMEM
    # on v7x) for a weight-DMA-bound kernel.
    act_bytes = batch * (state_dim + 3 * a_pad) * 4
    if grid[0] > 1 and act_bytes > 2 * weight_bytes:
        semantics = ("parallel",)
    else:
        semantics = ("arbitrary",)

    kernel = make_policy_kernel(num_hidden_layers, action_bound, a_pad)

    act_full, lp_full = pl.pallas_call(
        kernel,
        out_shape=out_shape,
        grid=grid,
        in_specs=in_specs,
        out_specs=out_specs,
        compiler_params=pltpu.CompilerParams(
            dimension_semantics=semantics,
            vmem_limit_bytes=vmem_limit,
        ),
    )(*inputs)

    # Drop the lane padding (contiguous leading-lane slice, tiny copies).
    return act_full[:, :action_dim], lp_full[:, :action_dim]


# ---------------------------------------------------------------------------
# Parameter construction (matches torch layer_init / PolicyNet layout).
# ---------------------------------------------------------------------------
def orthogonal_linear(key, in_dim, out_dim, std, bias_const=0.0):
    """Orthogonal init matching layer_init(); returns (W (in,out), b (1,out))."""
    w_torch_layout = jax.nn.initializers.orthogonal(scale=std)(
        key, (out_dim, in_dim), jnp.float32
    )
    w = jnp.transpose(w_torch_layout)                      # (in, out)
    b = jnp.full((1, out_dim), bias_const, dtype=jnp.float32)
    return w, b


def build_raw_params(key, state_dim, hidden_dim, num_hidden_layers, action_dim):
    """f32, un-fused parameters (used both for the kernel and the reference)."""
    keys = jax.random.split(key, num_hidden_layers + 2)
    hidden = []
    w, b = orthogonal_linear(keys[0], state_dim, hidden_dim, std=math.sqrt(2))
    hidden.append((w, b))
    for i in range(num_hidden_layers - 1):
        w, b = orthogonal_linear(keys[1 + i], hidden_dim, hidden_dim,
                                 std=math.sqrt(2))
        hidden.append((w, b))
    w_mu, b_mu = orthogonal_linear(keys[num_hidden_layers], hidden_dim,
                                   action_dim, std=0.01)
    w_std, b_std = orthogonal_linear(keys[num_hidden_layers + 1], hidden_dim,
                                     action_dim, std=math.sqrt(2))
    return {"hidden": hidden, "w_mu": w_mu, "b_mu": b_mu,
            "w_std": w_std, "b_std": b_std}


def prepare_kernel_params(raw, action_dim):
    """Cast weights to bf16 and fuse + lane-pad the mu/std heads."""
    a_pad = _round_up(action_dim, LANE)
    hidden_dim = raw["w_mu"].shape[0]

    hidden = [(w.astype(jnp.bfloat16), b) for w, b in raw["hidden"]]

    def pad_head(w, b):
        w_p = jnp.zeros((hidden_dim, a_pad), jnp.float32).at[:, :action_dim].set(w)
        b_p = jnp.zeros((1, a_pad), jnp.float32).at[:, :action_dim].set(b)
        return w_p, b_p

    w_mu_p, b_mu_p = pad_head(raw["w_mu"], raw["b_mu"])
    w_std_p, b_std_p = pad_head(raw["w_std"], raw["b_std"])
    # Fused head: [mu | std] with each head on its own 128-lane block.
    w_heads = jnp.concatenate([w_mu_p, w_std_p], axis=1).astype(jnp.bfloat16)
    b_heads = jnp.concatenate([b_mu_p, b_std_p], axis=1)   # f32
    return {"hidden": hidden, "heads": (w_heads, b_heads)}


def reference_forward(x, raw, eps, action_bound):
    """Pure-JAX f32 reference mirroring the torch module."""
    h = x
    for w, b in raw["hidden"]:
        h = jnp.maximum(h @ w + b, 0.0)
    mu = h @ raw["w_mu"] + raw["b_mu"]
    std = jax.nn.softplus(h @ raw["w_std"] + raw["b_std"])
    sample = mu + std * eps
    log_prob = (-0.5 * ((sample - mu) / std) ** 2 - jnp.log(std)
                - 0.5 * math.log(2.0 * math.pi))
    action = jnp.tanh(sample)
    log_prob = log_prob - jnp.log(1.0 - jnp.tanh(action) ** 2 + 1e-07)
    return action * action_bound, log_prob


if __name__ == "__main__":
    # Small, deterministic config.
    batch = 8
    state_dim = 16
    hidden_dim = 32
    num_hidden_layers = 2
    action_dim = 4
    action_bound = 2.0

    root = jax.random.PRNGKey(0)
    k_params, k_x, k_eps = jax.random.split(root, 3)

    raw = build_raw_params(k_params, state_dim, hidden_dim,
                           num_hidden_layers, action_dim)
    kparams = prepare_kernel_params(raw, action_dim)

    x = jax.random.normal(k_x, (batch, state_dim), dtype=jnp.float32)
    # Deterministic standard-normal noise for the reparameterized sample.
    eps = jax.random.normal(k_eps, (batch, action_dim), dtype=jnp.float32)

    fwd = jax.jit(partial(policy_net_forward,
                          num_hidden_layers=num_hidden_layers,
                          action_bound=action_bound))
    action, log_prob = fwd(x, kparams, eps)
    jax.block_until_ready((action, log_prob))

    # Shape / sanity checks.
    assert action.shape == (batch, action_dim)
    assert log_prob.shape == (batch, action_dim)
    assert bool(jnp.all(jnp.isfinite(action)))
    assert bool(jnp.all(jnp.isfinite(log_prob)))
    assert bool(jnp.all(jnp.abs(action) <= action_bound + 1e-5))

    # Loose numerical check vs. the f32 reference (kernel matmuls run in bf16
    # with f32 accumulation, so allow a generous tolerance).
    ref_action, ref_log_prob = reference_forward(x, raw, eps, action_bound)
    assert bool(jnp.allclose(action, ref_action, atol=1e-1, rtol=1e-1))
    assert bool(jnp.allclose(log_prob, ref_log_prob, atol=1e-1, rtol=1e-1))

    print("KERNEL_OK")
</pallas_src>

<mosaic_0001>
module attributes {stable_mosaic.version = 11 : i64} {
  func.func @kernel(%arg0: i32, %arg1: memref<8x16xf32, #tpu.memory_space<vmem>>, %arg2: memref<16x32xbf16, #tpu.memory_space<vmem>>, %arg3: memref<1x32xf32, #tpu.memory_space<vmem>>, %arg4: memref<32x32xbf16, #tpu.memory_space<vmem>>, %arg5: memref<1x32xf32, #tpu.memory_space<vmem>>, %arg6: memref<32x256xbf16, #tpu.memory_space<vmem>>, %arg7: memref<1x256xf32, #tpu.memory_space<vmem>>, %arg8: memref<8x128xf32, #tpu.memory_space<vmem>>, %arg9: memref<8x128xf32, #tpu.memory_space<vmem>>, %arg10: memref<8x128xf32, #tpu.memory_space<vmem>>) attributes {dimension_semantics = [#tpu.dimension_semantics<arbitrary>], iteration_bounds = array<i64: 1>, scalar_prefetch = 0 : i64, scratch_operands = 0 : i64, tpu.core_type = #tpu.core_type<tc>, window_params = [{transform_indices = @transform_0, window_bounds = array<i64: 8, 16>}, {pipeline_mode = #tpu.pipeline_mode<synchronous>, transform_indices = @transform_1, window_bounds = array<i64: 16, 32>}, {pipeline_mode = #tpu.pipeline_mode<synchronous>, transform_indices = @transform_2, window_bounds = array<i64: 1, 32>}, {pipeline_mode = #tpu.pipeline_mode<synchronous>, transform_indices = @transform_3, window_bounds = array<i64: 32, 32>}, {pipeline_mode = #tpu.pipeline_mode<synchronous>, transform_indices = @transform_4, window_bounds = array<i64: 1, 32>}, {pipeline_mode = #tpu.pipeline_mode<synchronous>, transform_indices = @transform_5, window_bounds = array<i64: 32, 256>}, {pipeline_mode = #tpu.pipeline_mode<synchronous>, transform_indices = @transform_6, window_bounds = array<i64: 1, 256>}, {transform_indices = @transform_7, window_bounds = array<i64: 8, 128>}, {transform_indices = @transform_8, window_bounds = array<i64: 8, 128>}, {transform_indices = @transform_9, window_bounds = array<i64: 8, 128>}]} {
    %c0 = arith.constant 0 : index
    %c0_0 = arith.constant 0 : index
    %0 = vector.load %arg1[%c0, %c0_0] : memref<8x16xf32, #tpu.memory_space<vmem>>, vector<8x16xf32>
    %c0_1 = arith.constant 0 : index
    %c0_2 = arith.constant 0 : index
    %1 = vector.load %arg2[%c0_1, %c0_2] : memref<16x32xbf16, #tpu.memory_space<vmem>>, vector<16x32xbf16>
    %c0_3 = arith.constant 0 : index
    %c0_4 = arith.constant 0 : index
    %2 = vector.load %arg3[%c0_3, %c0_4] : memref<1x32xf32, #tpu.memory_space<vmem>>, vector<1x32xf32>
    %3 = arith.truncf %0 : vector<8x16xf32> to vector<8x16xbf16>
    %cst = arith.constant dense<0.000000e+00> : vector<8x32xf32>
    %4 = tpu.matmul %3, %1, %cst {dimension_numbers = #tpu.dot_dimension_numbers<[1], [0], [0], [1], [0, 0, 1, 1], [], []>} : vector<8x16xbf16>, vector<16x32xbf16>, vector<8x32xf32> -> vector<8x32xf32>
    %5 = vector.broadcast %2 : vector<1x32xf32> to vector<8x32xf32>
    %6 = arith.addf %4, %5 : vector<8x32xf32>
    %cst_5 = arith.constant 0.000000e+00 : f32
    %7 = vector.broadcast %cst_5 : f32 to vector<8x32xf32>
    %8 = arith.maximumf %6, %7 : vector<8x32xf32>
    %c0_6 = arith.constant 0 : index
    %c0_7 = arith.constant 0 : index
    %9 = vector.load %arg4[%c0_6, %c0_7] : memref<32x32xbf16, #tpu.memory_space<vmem>>, vector<32x32xbf16>
    %c0_8 = arith.constant 0 : index
    %c0_9 = arith.constant 0 : index
    %10 = vector.load %arg5[%c0_8, %c0_9] : memref<1x32xf32, #tpu.memory_space<vmem>>, vector<1x32xf32>
    %11 = arith.truncf %8 : vector<8x32xf32> to vector<8x32xbf16>
    %cst_10 = arith.constant dense<0.000000e+00> : vector<8x32xf32>
    %12 = tpu.matmul %11, %9, %cst_10 {dimension_numbers = #tpu.dot_dimension_numbers<[1], [0], [0], [1], [0, 0, 1, 1], [], []>} : vector<8x32xbf16>, vector<32x32xbf16>, vector<8x32xf32> -> vector<8x32xf32>
    %13 = vector.broadcast %10 : vector<1x32xf32> to vector<8x32xf32>
    %14 = arith.addf %12, %13 : vector<8x32xf32>
    %cst_11 = arith.constant 0.000000e+00 : f32
    %15 = vector.broadcast %cst_11 : f32 to vector<8x32xf32>
    %16 = arith.maximumf %14, %15 : vector<8x32xf32>
    %c0_12 = arith.constant 0 : index
    %c0_13 = arith.constant 0 : index
    %17 = vector.load %arg6[%c0_12, %c0_13] : memref<32x256xbf16, #tpu.memory_space<vmem>>, vector<32x256xbf16>
    %c0_14 = arith.constant 0 : index
    %c0_15 = arith.constant 0 : index
    %18 = vector.load %arg7[%c0_14, %c0_15] : memref<1x256xf32, #tpu.memory_space<vmem>>, vector<1x256xf32>
    %c0_16 = arith.constant 0 : index
    %c0_17 = arith.constant 0 : index
    %19 = vector.load %arg8[%c0_16, %c0_17] : memref<8x128xf32, #tpu.memory_space<vmem>>, vector<8x128xf32>
    %20 = arith.truncf %16 : vector<8x32xf32> to vector<8x32xbf16>
    %cst_18 = arith.constant dense<0.000000e+00> : vector<8x256xf32>
    %21 = tpu.matmul %20, %17, %cst_18 {dimension_numbers = #tpu.dot_dimension_numbers<[1], [0], [0], [1], [0, 0, 1, 1], [], []>} : vector<8x32xbf16>, vector<32x256xbf16>, vector<8x256xf32> -> vector<8x256xf32>
    %22 = vector.broadcast %18 : vector<1x256xf32> to vector<8x256xf32>
    %23 = arith.addf %21, %22 : vector<8x256xf32>
    %24 = vector.extract_strided_slice %23 {offsets = [0, 0], sizes = [8, 128], strides = [1, 1]} : vector<8x256xf32> to vector<8x128xf32>
    %25 = vector.extract_strided_slice %23 {offsets = [0, 128], sizes = [8, 128], strides = [1, 1]} : vector<8x256xf32> to vector<8x128xf32>
    %cst_19 = arith.constant 0.000000e+00 : f32
    %26 = vector.broadcast %cst_19 : f32 to vector<8x128xf32>
    %27 = arith.maximumf %25, %26 : vector<8x128xf32>
    %28 = vector.broadcast %cst_19 : f32 to vector<8x128xf32>
    %29 = arith.subf %25, %28 : vector<8x128xf32>
    %30 = arith.cmpf one, %29, %29 : vector<8x128xf32>
    %31 = vector.broadcast %cst_19 : f32 to vector<8x128xf32>
    %32 = arith.addf %25, %31 : vector<8x128xf32>
    %33 = math.absf %29 : vector<8x128xf32>
    %cst_20 = arith.constant 0.000000e+00 : f32
    %34 = vector.broadcast %cst_20 : f32 to vector<8x128xf32>
    %35 = arith.subf %34, %33 : vector<8x128xf32>
    %36 = math.exp %35 : vector<8x128xf32>
    %37 = math.log1p %36 : vector<8x128xf32>
    %38 = arith.addf %27, %37 : vector<8x128xf32>
    %39 = arith.select %30, %32, %38 : vector<8x128xi1>, vector<8x128xf32>
    %40 = arith.mulf %39, %19 : vector<8x128xf32>
    %41 = arith.addf %24, %40 : vector<8x128xf32>
    %cst_21 = arith.constant -5.000000e-01 : f32
    %42 = vector.broadcast %cst_21 : f32 to vector<8x128xf32>
    %43 = arith.mulf %42, %19 : vector<8x128xf32>
    %44 = arith.mulf %43, %19 : vector<8x128xf32>
    %45 = math.log %39 : vector<8x128xf32>
    %46 = arith.subf %44, %45 : vector<8x128xf32>
    %cst_22 = arith.constant 0.918938517 : f32
    %47 = vector.broadcast %cst_22 : f32 to vector<8x128xf32>
    %48 = arith.subf %46, %47 : vector<8x128xf32>
    %49 = math.tanh %41 : vector<8x128xf32>
    %50 = math.tanh %49 : vector<8x128xf32>
    %51 = arith.mulf %50, %50 : vector<8x128xf32>
    %cst_23 = arith.constant 1.000000e+00 : f32
    %52 = vector.broadcast %cst_23 : f32 to vector<8x128xf32>
    %53 = arith.subf %52, %51 : vector<8x128xf32>
    %cst_24 = arith.constant 1.000000e-07 : f32
    %54 = vector.broadcast %cst_24 : f32 to vector<8x128xf32>
    %55 = arith.addf %53, %54 : vector<8x128xf32>
    %56 = math.log %55 : vector<8x128xf32>
    %57 = arith.subf %48, %56 : vector<8x128xf32>
    %cst_25 = arith.constant 2.000000e+00 : f32
    %58 = vector.broadcast %cst_25 : f32 to vector<8x128xf32>
    %59 = arith.mulf %49, %58 : vector<8x128xf32>
    %c0_26 = arith.constant 0 : index
    %c0_27 = arith.constant 0 : index
    %60 = vector.load %arg9[%c0_26, %c0_27] : memref<8x128xf32, #tpu.memory_space<vmem>>, vector<8x128xf32>
    tpu.vector_store %arg9[%c0_26, %c0_27], %59 {strides = array<i32>} : memref<8x128xf32, #tpu.memory_space<vmem>>, vector<8x128xf32>,
    %c0_28 = arith.constant 0 : index
    %c0_29 = arith.constant 0 : index
    %61 = vector.load %arg10[%c0_28, %c0_29] : memref<8x128xf32, #tpu.memory_space<vmem>>, vector<8x128xf32>
    tpu.vector_store %arg10[%c0_28, %c0_29], %57 {strides = array<i32>} : memref<8x128xf32, #tpu.memory_space<vmem>>, vector<8x128xf32>,
    return
  }
  func.func @transform_0(%arg0: i32) -> (i32, i32) {
    %c0_i32 = arith.constant 0 : i32
    %c0_i32_0 = arith.constant 0 : i32
    return %arg0, %c0_i32 : i32, i32
  }
  func.func @transform_1(%arg0: i32) -> (i32, i32) {
    %c0_i32 = arith.constant 0 : i32
    %c0_i32_0 = arith.constant 0 : i32
    %c0_i32_1 = arith.constant 0 : i32
    return %c0_i32, %c0_i32_0 : i32, i32
  }
  func.func @transform_2(%arg0: i32) -> (i32, i32) {
    %c0_i32 = arith.constant 0 : i32
    %c0_i32_0 = arith.constant 0 : i32
    %c0_i32_1 = arith.constant 0 : i32
    return %c0_i32, %c0_i32_0 : i32, i32
  }
  func.func @transform_3(%arg0: i32) -> (i32, i32) {
    %c0_i32 = arith.constant 0 : i32
    %c0_i32_0 = arith.constant 0 : i32
    %c0_i32_1 = arith.constant 0 : i32
    return %c0_i32, %c0_i32_0 : i32, i32
  }
  func.func @transform_4(%arg0: i32) -> (i32, i32) {
    %c0_i32 = arith.constant 0 : i32
    %c0_i32_0 = arith.constant 0 : i32
    %c0_i32_1 = arith.constant 0 : i32
    return %c0_i32, %c0_i32_0 : i32, i32
  }
  func.func @transform_5(%arg0: i32) -> (i32, i32) {
    %c0_i32 = arith.constant 0 : i32
    %c0_i32_0 = arith.constant 0 : i32
    %c0_i32_1 = arith.constant 0 : i32
    return %c0_i32, %c0_i32_0 : i32, i32
  }
  func.func @transform_6(%arg0: i32) -> (i32, i32) {
    %c0_i32 = arith.constant 0 : i32
    %c0_i32_0 = arith.constant 0 : i32
    %c0_i32_1 = arith.constant 0 : i32
    return %c0_i32, %c0_i32_0 : i32, i32
  }
  func.func @transform_7(%arg0: i32) -> (i32, i32) {
    %c0_i32 = arith.constant 0 : i32
    %c0_i32_0 = arith.constant 0 : i32
    return %arg0, %c0_i32 : i32, i32
  }
  func.func @transform_8(%arg0: i32) -> (i32, i32) {
    %c0_i32 = arith.constant 0 : i32
    %c0_i32_0 = arith.constant 0 : i32
    return %arg0, %c0_i32 : i32, i32
  }
  func.func @transform_9(%arg0: i32) -> (i32, i32) {
    %c0_i32 = arith.constant 0 : i32
    %c0_i32_0 = arith.constant 0 : i32
    return %arg0, %c0_i32 : i32, i32
  }
}

</mosaic_0001>

<bundles_post_ra>
// kernel: policy_net_forward.1
= control target key start
LH: loop header
LB: loop body
LE: loop exit
PB: predicated region body
PF: predicated region fallthrough
CT: control target
= control target key end

     0   :  { %15 = vsyncpa [#allocation3], 0  ;;  %s539_s0 = inlined_call_operand.hbm [shape: f32[8,16], index: 0, kind: input, shape index: {}]   ;;  %s540_s1 = inlined_call_operand.vmem [shape: bf16[16,32], index: 1, kind: input, shape index: {}]   ;;  %s541_s2 = inlined_call_operand.vmem [shape: f32[1,32], index: 2, kind: input, shape index: {}]   ;;  %s542_s3 = inlined_call_operand.vmem [shape: bf16[32,32], index: 3, kind: input, shape index: {}]   ;;  %s543_s4 = inlined_call_operand.vmem [shape: f32[1,32], index: 4, kind: input, shape index: {}]   ;;  %s544_s5 = inlined_call_operand.vmem [shape: bf16[32,256], index: 5, kind: input, shape index: {}]   ;;  %s545_s6 = inlined_call_operand.hbm [shape: f32[1,256], index: 6, kind: input, shape index: {}]   ;;  %s546_s7 = inlined_call_operand.vmem [shape: f32[8,128], index: 7, kind: input, shape index: {}]   ;;  %s547_s8 = inlined_call_operand.vmem [shape: f32[8,128], index: 8, kind: output, shape index: {0}]   ;;  %s548_s9 = inlined_call_operand.vmem [shape: f32[8,128], index: 9, kind: output, shape index: {1}]  }
   0x1   :  { %16 = vsyncpa [#allocation5], 0  ;;  %s422_s30 = smov [#allocation2]   ;;  %s423_s11 = smov [#allocation4]  }
   0x2   :  { %s23_s10 = sshll.u32 %s422_s30, 4  ;;  %s43_s12 = sshll.u32 %s423_s11, 4  ;;  %s24_s10 = int_to_ptr.vmem [resolvable:$true] %s23_s10  ;;  %s44_s12 = int_to_ptr.vmem [resolvable:$true] %s43_s12 }
   0x3   :  { %s374_s15 = scalar_lea.hbm %s539_s0, 128 }
   0x4   :  { %p375_p0 = scmp.ne.s32.totalorder %s539_s0, %s374_s15  ;;  %p378_p1 = scmp.lt.u32.totalorder %s374_s15, %s539_s0 }
   0x6   :  { %p380_p2 = pnand %p378_p1, %p375_p0 }
   0x8   :  { %383 = shalt.err (!%p380_p2)
}
   0x9   :  { %s384_s20 = scalar_lea.vmem %s24_s10, 128  ;;  %p389_p4 = scmp.lt.s32.totalorder %s24_s10, %s24_s10 }
   0xa   :  { %p385_p3 = scmp.ne.s32.totalorder %s24_s10, %s384_s20  ;;  %p390_p5 = scmp.lt.s32.totalorder %s384_s20, %s384_s20 }
   0xc   :  { %p391_p6 = por %p390_p5, %p389_p4 }
   0xe   :  { %p392_p7 = pnand %p391_p6, %p385_p3 }
  0x10   :  { %395 = shalt.err (!%p392_p7)
}
  0x11   :  { %26 = dma.hbm_to_vmem [thread:$0]  %s539_s0, 128, %s24_s10, [#allocation3]  }
  0x12   :  { %s396_s25 = scalar_lea.hbm %s545_s6, 32 }
  0x13   :  { %p397_p8 = scmp.ne.s32.totalorder %s545_s6, %s396_s25  ;;  %p400_p9 = scmp.lt.u32.totalorder %s396_s25, %s545_s6 }
  0x15   :  { %p402_p10 = pnand %p400_p9, %p397_p8 }
  0x17   :  { %405 = shalt.err (!%p402_p10)
}
  0x18   :  { %s406_s30 = scalar_lea.vmem %s44_s12, 32  ;;  %p411_p12 = scmp.lt.s32.totalorder %s44_s12, %s44_s12 }
  0x19   :  { %p407_p11 = scmp.ne.s32.totalorder %s44_s12, %s406_s30  ;;  %p412_p13 = scmp.lt.s32.totalorder %s406_s30, %s406_s30 }
  0x1b   :  { %p413_p0 = por %p412_p13, %p411_p12 }
  0x1d   :  { %p414_p1 = pnand %p413_p0, %p407_p11 }
  0x1f   :  { %417 = shalt.err (!%p414_p1)
}
  0x20   :  { %46 = dma.hbm_to_vmem [thread:$0]  %s545_s6, 32, %s44_s12, [#allocation5]  }
  0x21   :  { %418 = dma.done.wait [#allocation3], 128  }
  0x22   :  { %419 = vsyncadd [#allocation3], 4294967168 }
  0x23   :  { %420 = dma.done.wait [#allocation5], 32  }
  0x24   :  { %421 = vsyncadd [#allocation5], 4294967264  ;;  %v424_v0 = vmov 0.0   ;;  %vm425_vm0 = vmmov 0   ;;  %v353_v1 = vld [vmem:[%s540_s1] sm:$0xff]   ;;  %vm73_vm1 = vcmask 130048   ;;  %v195_v27 = vlaneseq }
  0x25   :  { %334 = vmatprep.subr.bf16.mxu0 %v424_v0  ;;  %336 = vmatprep.mubr.msk.bf16.mxu0 %vm425_vm0, %v424_v0  ;;  %v56_v2 = vld [vmem:[#allocation2] sm:$0xff]  ;;  %v355_v5 = vld [vmem:[%s542_s3 + $0x8] sm:$0xff]   ;;  %vm142_vm2 = vcmask 261120   ;;  %v361_v16 = vld [vmem:[%s544_s5 + $0x14] ss:$8 sps:$4 sm:$0xff]   ;;  %v426_v18 = vmov 0  }
  0x26   :  { %340 = vmatprep.subr.bf16.mxu1 %v424_v0  ;;  %344 = vmatprep.mubr.msk.bf16.mxu1 %vm425_vm0, %v424_v0  ;;  %v60_v3 = vpack.c.bf16 %v56_v2, %v56_v2  ;;  %v354_v4 = vld [vmem:[%s542_s3] sm:$0xff]   ;;  %v359_v17 = vld [vmem:[%s544_s5 + $0x10] ss:$8 sps:$4 sm:$0xff]   ;;  %v196_v28 = vshrl.u32 %v195_v27, 7  ;;  %v191_v30 = vld [vmem:[#allocation4] sm:$0x3] }
  0x27   :  { %335 = vmatpush3.bf16.msra.mxu0 %v353_v1  ;;  %341 = vmatpush3.bf16.msra.mxu1 %v354_v4  ;;  %v356_v6 = vld [vmem:[%s544_s5] ss:$8 sps:$4 sm:$0xff]   ;;  %v358_v7 = vld [vmem:[%s544_s5 + $0x4] ss:$8 sps:$4 sm:$0xff]  }
  0x28   :  { %342 = vmatprep.subr.bf16.mxu1 %v424_v0  ;;  %228 = vmatprep.subr.bf16.mxu0 %v358_v7  ;;  %v316_v8 = vld [vmem:[%s541_s2] ss:$0 sm:$0xff]  ;;  %v201_v29 = vsub.s32 1, %v196_v28  ;;  %v197_v45 = vsub.s32 0, %v196_v28 }
  0x29   :  { %v319_v19 = vld [vmem:[%s543_s4] ss:$0 sm:$0xff] }
  0x2a   :  { %337 = vmatmul.mubr.msk.bf16.vlgmr.msra.gmra.mrb[0].mxu0 %vm73_vm1, %v60_v3  ;;  %v202_v31 = vrot.slane %v191_v30, %v201_v29  ;;  %v198_v50 = vrot.slane %v191_v30, %v197_v45  ;;  %v192_v52 = vld [vmem:[%s546_s7] sm:$0xff] }
  0x2b   :  { %343 = vmatpush3.bf16.msra.mxu1 %v355_v5  ;;  %229 = vmatpush1.bf16.msra.mxu0 %v356_v6  ;;  %v289_v0 = vmul.f32 -0.5, %v192_v52 }
  0x2c   :  { %230 = vmatprep.subr.bf16.mxu0 %v361_v16  ;;  %260 = vmatprep.mubr.bf16.mxu0 %v426_v18 }
  0x2d   :  { %v290_v2 = vmul.f32 %v289_v0, %v192_v52 }
  0x2f   :  { %231 = vmatpush1.bf16.msra.mxu0 %v359_v17 }
  0xfd   :  { %v111_v9 = vpop.f32.mrb[0].mxu0 }
  0xfe   :  { %v112_v10 = vadd.f32 %v316_v8, %v111_v9  ;;  %v338_v11 = vpop.f32.mrb[1].mxu0 }
  0xff   :  { %v114_v12 = vpop.f32.mrb[2].mxu0 }
 0x100   :  { %v117_v13 = vmax.f32 %v112_v10, 0.0  ;;  %v339_v14 = vpop.f32.mrb[3].mxu0 }
 0x102   :  { %v123_v15 = vpack.c.bf16 %v117_v13, %v117_v13 }
 0x104   :  { %345 = vmatmul.mubr.msk.bf16.vlgmr.msra.gmra.mrb[0].mxu1 %vm142_vm2, %v123_v15 }
 0x1d7   :  { %v180_v20 = vpop.f32.mrb[0].mxu1 }
 0x1d8   :  { %v181_v21 = vadd.f32 %v319_v19, %v180_v20  ;;  %v346_v22 = vpop.f32.mrb[1].mxu1 }
 0x1d9   :  { %v183_v23 = vpop.f32.mrb[2].mxu1 }
 0x1da   :  { %v186_v24 = vmax.f32 %v181_v21, 0.0  ;;  %v347_v25 = vpop.f32.mrb[3].mxu1 }
 0x1dc   :  { %v193_v26 = vpack.c.bf16 %v186_v24, %v186_v24 }
 0x1de   :  { %327 = vmatmul.mubr.msk.bf16.vlgmr.msra.gmra.mrb[4].mxu0 %vm142_vm2, %v193_v26 }
 0x2b1   :  { %v262_v32 = vpop.f32.mrb[4].mxu0 }
 0x2b2   :  { %v264_v33 = vpop.f32.mrb[5].mxu0  ;;  %v263_v55 = vadd.f32 %v262_v32, %v198_v50 }
 0x2b3   :  { %v265_v34 = vadd.f32 %v264_v33, %v202_v31  ;;  %v266_v35 = vpop.f32.mrb[6].mxu0 }
 0x2b4   :  { %v267_v36 = vpop.f32.mrb[7].mxu0 }
 0x2b5   :  { %v272_v37 = vand.u32 2147483647, %v265_v34  ;;  %v269_v49 = vmax.f32 %v265_v34, 0.0  ;;  %vm270_vm4 = vcmp.ne.f32.partialorder %v265_v34, %v265_v34 }
 0x2b7   :  { %v273_v38 = vsub.f32 0.0, %v272_v37 }
 0x2b9   :  { %v274_v39 = vmul.f32 1.442695, %v273_v38 }
 0x2bb   :  { %362 = vpow2.f32 %v274_v39 }
 0x2c5   :  { %v363_v40 = vpop.eup %362 }
 0x2c6   :  { %v276_v41 = vadd.f32 1.0, %v363_v40  ;;  %v279_v42 = vmul.f32 -0.5, %v363_v40  ;;  %v282_v44 = vand.u32 2147483647, %v363_v40 }
 0x2c8   :  { %364 = vlog2.f32 %v276_v41  ;;  %v280_v43 = vadd.f32 1.0, %v279_v42  ;;  %vm283_vm3 = vcmp.lt.f32.partialorder %v282_v44, 0.0004427343 }
 0x2ca   :  { %v281_v48 = vmul.f32 %v363_v40, %v280_v43 }
 0x2d2   :  { %v365_v46 = vpop.eup %364 }
 0x2d3   :  { %v278_v47 = vmul.f32 0.6931472, %v365_v46 }
 0x2d5   :  { %v284_v51 = vsel %vm283_vm3, %v281_v48, %v278_v47 }
 0x2d6   :  { %v285_v53 = vadd.f32 %v284_v51, %v269_v49 }
 0x2d8   :  { %v286_v54 = vsel %vm270_vm4, %v265_v34, %v285_v53 }
 0x2d9   :  { %v287_v56 = vmul.f32 %v286_v54, %v192_v52 }
 0x2db   :  { %v288_v57 = vadd.f32 %v287_v56, %v263_v55 }
 0x2dd   :  { %366 = vtanh.f32 %v288_v57 }
 0x2e7   :  { %v367_v58 = vpop.eup %366 }
 0x2e8   :  { %368 = vtanh.f32 %v367_v58  ;;  %v303_v59 = vmul.f32 2.0, %v367_v58 }
 0x2e9   :  { %370 = vlog2.f32 %v286_v54 }
 0x2ea   :  { %304 = vst [vmem:[%s547_s8] sm:$0xff] %v303_v59 }
 0x2f2   :  { %v369_v60 = vpop.eup %368 }
 0x2f3   :  { %v297_v61 = vmul.f32 %v369_v60, %v369_v60  ;;  %v371_v1 = vpop.eup %370 }
 0x2f4   :  { %v292_v3 = vmul.f32 0.6931472, %v371_v1 }
 0x2f5   :  { %v298_v62 = vsub.f32 1.0, %v297_v61 }
 0x2f6   :  { %v293_v4 = vsub.f32 %v290_v2, %v292_v3 }
 0x2f7   :  { %v299_v63 = vadd.f32 1e-07, %v298_v62 }
 0x2f8   :  { %v328_v6 = vadd.f32 -0.9189385, %v293_v4 }
 0x2f9   :  { %372 = vlog2.f32 %v299_v63 }
 0x303   :  { %v373_v5 = vpop.eup %372 }
 0x304   :  { %v301_v7 = vmul.f32 0.6931472, %v373_v5 }
 0x306   :  { %v302_v8 = vsub.f32 %v328_v6, %v301_v7 }
 0x308   :  { %305 = vst [vmem:[%s548_s9] sm:$0xff] %v302_v8 }
 0x309   :  { %314 = vsyncpa [#allocation3], 1 }
 0x30a   :  { %315 = vsyncpa [#allocation5], 1 }

</bundles_post_ra>
